<compile_context>
chip_gen: v5e
topology: v5e:2x2
jax: 0.10.0
libtpu: 0.0.40
codegen_flags: <defaults>
</compile_context>

<pallas_src>
import functools
from typing import NamedTuple

import jax
import jax.numpy as jnp
from jax.experimental import pallas as pl
from jax.experimental.pallas import tpu as pltpu


def _round_up(x, m):
    return ((x + m - 1) // m) * m


def _cdiv(a, b):
    return (a + b - 1) // b


# --------------------------------------------------------------------------
# Kernel 1: propagation matrix  M = (I + DA + DA^2 + ... + DA^layers) @ diag(1/len)
# Tiny [B_pad, B_pad] problem, ungridded, runs once per forward.
# --------------------------------------------------------------------------
def propagation_kernel(d_ref, a_ref, len_ref, m_ref, *, layers):
    b = d_ref.shape[0]
    da = jnp.dot(d_ref[...], a_ref[...], preferred_element_type=jnp.float32)

    row = jax.lax.broadcasted_iota(jnp.int32, (b, b), 0)
    col = jax.lax.broadcasted_iota(jnp.int32, (b, b), 1)
    eye = jnp.where(row == col, 1.0, 0.0).astype(jnp.float32)

    acc = eye
    x = eye
    for _ in range(layers):                       # layers is small & static
        x = jnp.dot(da, x, preferred_element_type=jnp.float32)
        acc = acc + x

    # fold the mean-pool division into M's columns:  M[:, j] *= 1/len[j]
    safe_len = jnp.maximum(len_ref[...], 1.0)     # guard padding-only sessions
    inv_len = pl.reciprocal(safe_len, approx=False)   # [1, B_pad]
    m_ref[...] = acc * inv_len


# --------------------------------------------------------------------------
# Kernel 2: grid = (num_cores, num_item_tiles); per step
#   acc += P_tile @ emb_tile          (bag-of-items pooling, MXU, bf16 -> f32)
#   on last item tile of this core:  out[core] = M @ acc   (layer propagation)
# P and the embedding table are each read exactly once across the whole grid.
# --------------------------------------------------------------------------
def lineconv_kernel(p_ref, emb_ref, m_ref, out_ref, acc_ref):
    n = pl.program_id(1)

    @pl.when(n == 0)
    def _init():
        acc_ref[...] = jnp.zeros_like(acc_ref)

    acc_ref[...] += jnp.dot(
        p_ref[...], emb_ref[...], preferred_element_type=jnp.float32
    )

    @pl.when(n == pl.num_programs(1) - 1)
    def _finalize():
        out_ref[...] = jnp.dot(
            m_ref[...], acc_ref[...], preferred_element_type=jnp.float32
        ).astype(out_ref.dtype)


# --------------------------------------------------------------------------
# Hoisted (call-once) table preparation + tiling plan
# --------------------------------------------------------------------------
class LineConvPlan(NamedTuple):
    rows: int        # n_items + 1 (incl. zero padding row at index 0)
    emb_size: int
    tile_n: int      # item-axis tile (multiple of 128)
    n_pad: int       # padded item-axis extent = num_cores * num_n * tile_n
    num_n: int       # item tiles per core
    num_cores: int   # leading "parallel" grid axis (2 when >= 2 item tiles)


def prepare_lineconv_tables(item_embedding, *, compute_dtype=jnp.bfloat16,
                            max_tile_n=8192, target_tile_bytes=4 * 1024 * 1024):
    """Pad + cast the item table ONCE (hoisted out of the per-forward path)."""
    n_items, emb_size = item_embedding.shape
    rows = n_items + 1
    row_bytes = emb_size * jnp.dtype(compute_dtype).itemsize

    n_needed = _round_up(rows, 128)
    # size the item tile so each emb DMA step moves ~target_tile_bytes
    tile_n = _round_up(max(128, target_tile_bytes // max(row_bytes, 1)), 128)
    tile_n = max(128, min(tile_n, max_tile_n, n_needed))
    tile_n = _round_up(tile_n, 128)

    tiles = _cdiv(n_needed, tile_n)
    num_cores = 2 if tiles >= 2 else 1          # real 2-way parallel axis for v7x
    num_n = _cdiv(tiles, num_cores)
    n_pad = num_cores * num_n * tile_n

    emb_tbl = jnp.zeros((n_pad, emb_size), compute_dtype)
    emb_tbl = emb_tbl.at[1:rows].set(item_embedding.astype(compute_dtype))

    plan = LineConvPlan(rows, emb_size, tile_n, n_pad, num_n, num_cores)
    return emb_tbl, plan


# --------------------------------------------------------------------------
# Forward
# --------------------------------------------------------------------------
def lineconv_forward(emb_tbl, plan, D, A, session_item, session_len, *, layers):
    """JAX/Pallas equivalent of LineConv.forward (emb_tbl from prepare_lineconv_tables)."""
    B = session_item.shape[0]
    E = plan.emb_size
    B_pad = _round_up(B, 16)                    # bf16 sublane tile
    f32 = jnp.float32
    cd = emb_tbl.dtype
    cd_bytes = jnp.dtype(cd).itemsize

    # --- glue (plain JAX, per-call): counts matrix, padded D/A/len ----------
    # bag-of-items counts P[b, j] = #{s : session_item[b, s] == j}
    # (small-integer counts are exact in bf16; out-of-range indices are dropped
    #  by the JAX scatter whereas torch.index_select would error)
    counts = jnp.zeros((B_pad, plan.n_pad), f32)
    batch_idx = jnp.arange(B, dtype=jnp.int32)[:, None]
    counts = counts.at[batch_idx, session_item].add(
        jnp.ones(session_item.shape, f32)
    )
    P = counts.astype(cd)
    # TODO(synk): for very large catalogs (n_items >> B*S) replace the dense P
    # matmul with a scalar-prefetched in-kernel row gather (manual async copies).

    D_pad = jnp.zeros((B_pad, B_pad), f32).at[:B, :B].set(D.astype(f32))
    A_pad = jnp.zeros((B_pad, B_pad), f32).at[:B, :B].set(A.astype(f32))
    len_row = jnp.ones((1, B_pad), f32).at[0, :B].set(
        jnp.reshape(session_len.astype(f32), (-1,))[:B]
    )

    # --- kernel 1: propagation matrix (runs once, tiny) ---------------------
    M = pl.pallas_call(
        functools.partial(propagation_kernel, layers=layers),
        out_shape=jax.ShapeDtypeStruct((B_pad, B_pad), f32),
        in_specs=[
            pl.BlockSpec(memory_space=pltpu.MemorySpace.VMEM),  # D
            pl.BlockSpec(memory_space=pltpu.MemorySpace.VMEM),  # A
            pl.BlockSpec(memory_space=pltpu.MemorySpace.VMEM),  # session_len row
        ],
        out_specs=pl.BlockSpec(memory_space=pltpu.MemorySpace.VMEM),
    )(D_pad, A_pad, len_row)

    # --- kernel 2: gridded pooling + propagation -----------------------------
    tile_n = plan.tile_n
    num_n = plan.num_n
    num_cores = plan.num_cores

    # per-step VMEM footprint (double-buffered inputs + f32 acc + M + out slab)
    step_bytes = (2 * tile_n * E * cd_bytes          # emb tile x2
                  + 2 * B_pad * tile_n * cd_bytes    # P tile x2
                  + B_pad * E * 4                    # accumulator
                  + 2 * B_pad * B_pad * 4            # M x2
                  + 2 * B_pad * E * 4)               # out slab x2
    vmem_limit = int(min(64 * 2**20, max(32 * 2**20, 2 * step_bytes)))

    cost = pl.CostEstimate(
        flops=2 * B_pad * plan.n_pad * E + 2 * num_cores * B_pad * B_pad * E,
        transcendentals=0,
        bytes_accessed=(plan.n_pad * E * cd_bytes          # emb table, read once
                        + B_pad * plan.n_pad * cd_bytes    # P, read once
                        + B_pad * B_pad * 4                # M
                        + num_cores * B_pad * E * 4),      # output slabs
    )

    parts = pl.pallas_call(
        lineconv_kernel,
        out_shape=jax.ShapeDtypeStruct((num_cores, B_pad, E), f32),
        grid_spec=pltpu.PrefetchScalarGridSpec(
            num_scalar_prefetch=0,
            grid=(num_cores, num_n),          # cores parallel, items (reduction) last
            in_specs=[
                pl.BlockSpec((B_pad, tile_n),
                             lambda c, n: (0, c * num_n + n)),      # P (read once)
                pl.BlockSpec((tile_n, E),
                             lambda c, n: (c * num_n + n, 0)),      # emb (read once)
                pl.BlockSpec((B_pad, B_pad), lambda c, n: (0, 0)),  # M (resident)
            ],
            out_specs=pl.BlockSpec((None, B_pad, E), lambda c, n: (c, 0, 0)),
            scratch_shapes=[pltpu.VMEM((B_pad, E), jnp.float32)],
        ),
        compiler_params=pltpu.CompilerParams(
            dimension_semantics=("parallel", "arbitrary"),
            vmem_limit_bytes=vmem_limit,
        ),
        cost_estimate=cost,
    )(P, emb_tbl, M)

    # trivial epilogue: M is linear, so summing the per-core partials is exact
    out_pad = parts[0] if num_cores == 1 else jnp.sum(parts, axis=0)
    return out_pad[:B, :E]


# --------------------------------------------------------------------------
# Pure-JAX reference (mirrors the PyTorch module, f32)
# --------------------------------------------------------------------------
def lineconv_reference(item_embedding, D, A, session_item, session_len, *, layers):
    E = item_embedding.shape[1]
    emb = jnp.concatenate(
        [jnp.zeros((1, E), item_embedding.dtype), item_embedding], axis=0
    )
    seq_h = jnp.take(emb, session_item, axis=0)
    x = jnp.sum(seq_h, axis=1) / session_len
    DA = D @ A
    acc = x
    for _ in range(layers):
        x = DA @ x
        acc = acc + x
    return acc


def _run_case(key, *, batch_size, seq_len, emb_size, n_items, layers, max_tile_n):
    k_emb, k_d, k_a, k_items, k_len = jax.random.split(key, 5)
    item_embedding = jax.random.normal(k_emb, (n_items, emb_size), dtype=jnp.float32)
    D = jax.random.normal(k_d, (batch_size, batch_size), dtype=jnp.float32) * 0.1
    A = jax.random.normal(k_a, (batch_size, batch_size), dtype=jnp.float32) * 0.1
    session_item = jax.random.randint(
        k_items, (batch_size, seq_len), 0, n_items + 1, dtype=jnp.int32
    )
    session_len = jax.random.randint(
        k_len, (batch_size, 1), 1, seq_len + 1
    ).astype(jnp.float32)

    # hoisted table prep (call once, reuse across forwards)
    emb_tbl, plan = prepare_lineconv_tables(item_embedding, max_tile_n=max_tile_n)

    out = lineconv_forward(
        emb_tbl, plan, D, A, session_item, session_len, layers=layers
    )
    jax.block_until_ready(out)
    assert out.shape == (batch_size, emb_size)

    ref = lineconv_reference(
        item_embedding, D, A, session_item, session_len, layers=layers
    )
    assert jnp.allclose(out, ref, rtol=5e-2, atol=5e-2), (
        f"max abs err {float(jnp.max(jnp.abs(out - ref)))}"
    )


if __name__ == "__main__":
    key = jax.random.PRNGKey(0)
    k1, k2 = jax.random.split(key)

    # case 1: tiny shapes, single tile / single core path
    _run_case(k1, batch_size=8, seq_len=8, emb_size=32, n_items=20, layers=2,
              max_tile_n=8192)

    # case 2: forced-small item tiles to exercise the multi-tile reduction,
    # the 2-way core split, and the partial-sum epilogue
    _run_case(k2, batch_size=8, seq_len=12, emb_size=32, n_items=300, layers=3,
              max_tile_n=128)

    print("KERNEL_OK")
</pallas_src>

<mosaic_0001>
module attributes {stable_mosaic.version = 11 : i64} {
  func.func @propagation_kernel(%arg0: memref<16x16xf32, #tpu.memory_space<vmem>>, %arg1: memref<16x16xf32, #tpu.memory_space<vmem>>, %arg2: memref<1x16xf32, #tpu.memory_space<vmem>>, %arg3: memref<16x16xf32, #tpu.memory_space<vmem>>) attributes {dimension_semantics = [], scalar_prefetch = 0 : i64, scratch_operands = 0 : i64, tpu.core_type = #tpu.core_type<tc>} {
    %c0 = arith.constant 0 : index
    %c0_0 = arith.constant 0 : index
    %0 = vector.load %arg0[%c0, %c0_0] : memref<16x16xf32, #tpu.memory_space<vmem>>, vector<16x16xf32>
    %c0_1 = arith.constant 0 : index
    %c0_2 = arith.constant 0 : index
    %1 = vector.load %arg1[%c0_1, %c0_2] : memref<16x16xf32, #tpu.memory_space<vmem>>, vector<16x16xf32>
    %cst = arith.constant dense<0.000000e+00> : vector<16x16xf32>
    %2 = tpu.matmul %0, %1, %cst {dimension_numbers = #tpu.dot_dimension_numbers<[1], [0], [0], [1], [0, 0, 1, 1], [], []>} : vector<16x16xf32>, vector<16x16xf32>, vector<16x16xf32> -> vector<16x16xf32>
    %3 = tpu.iota {dimensions = array<i32: 0>} : vector<16x16xi32>
    %4 = tpu.iota {dimensions = array<i32: 1>} : vector<16x16xi32>
    %5 = arith.cmpi eq, %3, %4 : vector<16x16xi32>
    %cst_3 = arith.constant 1.000000e+00 : f32
    %cst_4 = arith.constant 0.000000e+00 : f32
    %6 = vector.broadcast %cst_3 : f32 to vector<16x16xf32>
    %7 = vector.broadcast %cst_4 : f32 to vector<16x16xf32>
    %8 = arith.select %5, %6, %7 : vector<16x16xi1>, vector<16x16xf32>
    %cst_5 = arith.constant dense<0.000000e+00> : vector<16x16xf32>
    %9 = tpu.matmul %2, %8, %cst_5 {dimension_numbers = #tpu.dot_dimension_numbers<[1], [0], [0], [1], [0, 0, 1, 1], [], []>} : vector<16x16xf32>, vector<16x16xf32>, vector<16x16xf32> -> vector<16x16xf32>
    %10 = arith.addf %8, %9 : vector<16x16xf32>
    %cst_6 = arith.constant dense<0.000000e+00> : vector<16x16xf32>
    %11 = tpu.matmul %2, %9, %cst_6 {dimension_numbers = #tpu.dot_dimension_numbers<[1], [0], [0], [1], [0, 0, 1, 1], [], []>} : vector<16x16xf32>, vector<16x16xf32>, vector<16x16xf32> -> vector<16x16xf32>
    %12 = arith.addf %10, %11 : vector<16x16xf32>
    %c0_7 = arith.constant 0 : index
    %c0_8 = arith.constant 0 : index
    %13 = vector.load %arg2[%c0_7, %c0_8] : memref<1x16xf32, #tpu.memory_space<vmem>>, vector<1x16xf32>
    %cst_9 = arith.constant 1.000000e+00 : f32
    %14 = vector.broadcast %cst_9 : f32 to vector<1x16xf32>
    %15 = arith.maximumf %13, %14 : vector<1x16xf32>
    %16 = tpu.reciprocal %15 : vector<1x16xf32> -> vector<1x16xf32>
    %17 = vector.broadcast %16 : vector<1x16xf32> to vector<16x16xf32>
    %18 = arith.mulf %12, %17 : vector<16x16xf32>
    %c0_10 = arith.constant 0 : index
    %c0_11 = arith.constant 0 : index
    %19 = vector.load %arg3[%c0_10, %c0_11] : memref<16x16xf32, #tpu.memory_space<vmem>>, vector<16x16xf32>
    tpu.vector_store %arg3[%c0_10, %c0_11], %18 {strides = array<i32>} : memref<16x16xf32, #tpu.memory_space<vmem>>, vector<16x16xf32>,
    return
  }
}

</mosaic_0001>

<bundles_post_ra>
// kernel: tpu_custom_call.1
= control target key start
LH: loop header
LB: loop body
LE: loop exit
PB: predicated region body
PF: predicated region fallthrough
CT: control target
= control target key end

     0   :  { %8 = vsyncpa [#allocation3], 0  ;;  %s344_s0 = inlined_call_operand.hbm [shape: f32[16,16], index: 0, kind: input, shape index: {}]   ;;  %s345_s1 = inlined_call_operand.hbm [shape: f32[16,16], index: 1, kind: input, shape index: {}]   ;;  %s346_s2 = inlined_call_operand.vmem [shape: f32[1,16], index: 2, kind: input, shape index: {}]   ;;  %s347_s3 = inlined_call_operand.hbm [shape: f32[16,16], index: 3, kind: output, shape index: {}]  }
   0x1   :  { %9 = vsyncpa [#allocation6], 0 }
   0x2   :  { %10 = vsyncpa [#allocation4], 0  ;;  %s15_s14 = sshll.u32 %s344_s0, 4  ;;  %s286_s15 = smov [#allocation2]   ;;  %s16_s14 = int_to_ptr.hbm [resolvable:$true] %s15_s14 }
   0x3   :  { %s17_s16 = sshll.u32 %s286_s15, 4  ;;  %s28_s19 = sshll.u32 %s345_s1, 4  ;;  %s18_s16 = int_to_ptr.vmem [resolvable:$true] %s17_s16  ;;  %s29_s19 = int_to_ptr.hbm [resolvable:$true] %s28_s19 }
   0x4   :  { %s287_s20 = smov 128   ;;  %s288_s21 = smov 8  }
   0x5   :  { %23 = dma.hbm_to_vmem [thread:$0]  %s16_s14, 256, %s18_s16, [#allocation3], %s287_s20, %s287_s20, %s288_s21  }
   0x6   :  { %s289_s22 = smov [#allocation5]  }
   0x7   :  { %s30_s23 = sshll.u32 %s289_s22, 4  ;;  %s31_s23 = int_to_ptr.vmem [resolvable:$true] %s30_s23 }
   0x8   :  { %36 = dma.hbm_to_vmem [thread:$0]  %s29_s19, 256, %s31_s23, [#allocation6], %s287_s20, %s287_s20, %s288_s21  }
   0x9   :  { %280 = dma.done.wait [#allocation3], 256  }
   0xa   :  { %281 = vsyncadd [#allocation3], 4294967040 }
   0xb   :  { %282 = dma.done.wait [#allocation6], 256  }
   0xc   :  { %283 = vsyncadd [#allocation6], 4294967040  ;;  %v81_v0 = vlaneseq  ;;  %v50_v4 = vld [vmem:[#allocation5 + $0x8] sm:$0xff]  ;;  %v49_v5 = vld [vmem:[#allocation5] sm:$0xff]  ;;  %v290_v6 = vmov 1.0   ;;  %vm51_vm1 = vcmask 130048  }
   0xd   :  { %72 = vmatpush.msra.mxu0 %v50_v4  ;;  %197 = vmatpush.msra.mxu3 %v50_v4  ;;  %v47_v7 = vld [vmem:[#allocation2] sm:$0xff]  ;;  %v48_v8 = vld [vmem:[#allocation2 + $0x8] sm:$0xff]  ;;  %v291_v11 = vmov 0.0   ;;  %s175_s27 = sshll.u32 %s347_s3, 4  ;;  %s176_s27 = int_to_ptr.hbm [resolvable:$true] %s175_s27 }
   0xe   :  { %v82_v1 = vshrl.u32 %v81_v0, 7  ;;  %v85_v2 = vand.u32 127, %v81_v0  ;;  %v146_v16 = vld [vmem:[%s346_s2] sm:$0x1]  ;;  %s292_s2 = smov [#allocation7]  }
   0xf   :  { %73 = vmatpush.msra.mxu0 %v49_v5  ;;  %198 = vmatpush.msra.mxu3 %v49_v5  ;;  %v147_v17 = vmax.f32 %v146_v16, 1.0  ;;  %s173_s24 = sshll.u32 %s292_s2, 4  ;;  %s174_s24 = int_to_ptr.vmem [resolvable:$true] %s173_s24 }
  0x10   :  { %v83_v3 = vadd.s32 8, %v82_v1  ;;  %189 = vmatmul.msk.f32.vlgmr.msra.gmra.mxu0 %vm51_vm1, %v47_v7  ;;  %190 = vmatmul.msk.f32.vlgmr.msra.gmra.mxu3 %vm51_vm1, %v48_v8  ;;  %vm86_vm2 = vcmp.eq.s32.totalorder %v82_v1, %v85_v2 }
  0x11   :  { %v88_v12 = vsel %vm86_vm2, 1.0, %v291_v11  ;;  %206 = vrcp.f32 %v147_v17  ;;  %vm153_vm3 = vweird.f32 %v147_v17  ;;  %v159_v22 = vand.u32 2147483648, %v147_v17 }
  0x12   :  { %vm87_vm0 = vcmp.eq.s32.totalorder %v83_v3, %v85_v2  ;;  %v157_v24 = vand.u32 2147483647, %v147_v17 }
  0x13   :  { %191 = vmatpush.msk.msra.mxu1 %vm87_vm0, %v290_v6  ;;  %v160_v25 = vor.u32 1.1754944e-38, %v159_v22  ;;  %v89_v32 = vsel %vm87_vm0, 1.0, %v291_v11 }
  0x14   :  { %vm158_vm6 = vcmp.eq.f32.partialorder %v157_v24, 8.507059e+37 }
  0x15   :  { %192 = vmatpush.msk.msra.mxu1 %vm86_vm2, %v290_v6 }
  0x17   :  { %v207_v18 = vpop.eup %206 }
  0x18   :  { %v149_v19 = vmul.f32 %v207_v18, %v147_v17  ;;  %vm154_vm4 = vweird.f32 %v207_v18 }
  0x19   :  { %vm155_vm5 = vmor %vm153_vm3, %vm154_vm4 }
  0x1a   :  { %v150_v20 = vsub.f32 1.0, %v149_v19 }
  0x1c   :  { %v151_v21 = vmul.f32 %v207_v18, %v150_v20 }
  0x1e   :  { %v152_v23 = vadd.f32 %v207_v18, %v151_v21 }
  0x20   :  { %v156_v26 = vsel %vm155_vm5, %v207_v18, %v152_v23 }
  0x21   :  { %v161_v27 = vsel %vm158_vm6, %v160_v25, %v156_v26 }
  0x22   :  { %v163_v28 = vperm.slane %v161_v27, 0 }
  0x8d   :  { %v75_v9 = vpop.f32.mrf.mxu0 }
  0x8e   :  { %193 = vmatmul.msk.f32.vlgmr.msra.gmra.mxu1 %vm51_vm1, %v75_v9 }
  0x93   :  { %v78_v10 = vpop.f32.mrf.mxu3 }
  0x96   :  { %194 = vmatmul.msk.f32.gmra.mxu1 %vm51_vm1, %v78_v10 }
 0x10b   :  { %v113_v13 = vpop.f32.mrf.mxu1 }
 0x10c   :  { %v119_v14 = vadd.f32 %v113_v13, %v88_v12 }
 0x113   :  { %v116_v15 = vpop.f32.mrf.mxu1 }
 0x114   :  { %135 = vmatpush.msra.mxu2 %v116_v15  ;;  %v120_v33 = vadd.f32 %v116_v15, %v89_v32 }
 0x116   :  { %136 = vmatpush.msra.mxu2 %v113_v13 }
 0x117   :  { %195 = vmatmul.msk.f32.vlgmr.msra.gmra.mxu2 %vm51_vm1, %v75_v9 }
 0x11f   :  { %196 = vmatmul.msk.f32.gmra.mxu2 %vm51_vm1, %v78_v10 }
 0x19a   :  { %v138_v29 = vpop.f32.mrf.mxu2 }
 0x19b   :  { %v144_v30 = vadd.f32 %v138_v29, %v119_v14 }
 0x19d   :  { %v165_v31 = vmul.f32 %v163_v28, %v144_v30 }
 0x19f   :  { %167 = vst.msk [vmem:[#allocation7] sm:$0xff] %vm51_vm1, %v165_v31 }
 0x1a2   :  { %v141_v34 = vpop.f32.mrf.mxu2 }
 0x1a3   :  { %v145_v35 = vadd.f32 %v141_v34, %v120_v33 }
 0x1a5   :  { %v166_v36 = vmul.f32 %v163_v28, %v145_v35 }
 0x1a7   :  { %168 = vst.msk [vmem:[#allocation7 + $0x8] sm:$0xff] %vm51_vm1, %v166_v36 }
 0x1a8   :  { %181 = dma.vmem_to_hbm [thread:$0]  %s174_s24, 256, %s176_s27, [#allocation4], %s287_s20, %s287_s20, %s288_s21  }
 0x1a9   :  { %284 = dma.done.wait [#allocation4], 256  }
 0x1aa   :  { %285 = vsyncadd [#allocation4], 4294967040 }
 0x1ab   :  { %186 = vsyncpa [#allocation3], 1 }
 0x1ac   :  { %187 = vsyncpa [#allocation6], 1 }
 0x1ad   :  { %188 = vsyncpa [#allocation4], 1 }

</bundles_post_ra>
